<compile_context>
chip_gen: v6e
topology: v6e:2x2x1
jax: 0.10.0
libtpu: 0.0.40
codegen_flags: <defaults>
</compile_context>

<pallas_src>
import functools

import jax
import jax.numpy as jnp
from jax.experimental import pallas as pl
from jax.experimental.pallas import tpu as pltpu


def _round_up(x, m):
    return ((x + m - 1) // m) * m


def _focal_loss_kernel(x_ref, t_ref, a_ref, o_ref, *, gamma, n_total, block_n):
    # x_ref: (block_n, C) logits tile (source dtype, cast to f32 here)
    # t_ref: (block_n, 1) int32 target class ids
    # a_ref: (1, C) alpha weights (same block every grid step)
    # o_ref: (1, 1, 128) per-chunk partial sum (broadcast across lanes)
    x = x_ref[...].astype(jnp.float32)
    t = t_ref[...]
    a = a_ref[...].astype(jnp.float32)

    bn, c = x.shape
    col = jax.lax.broadcasted_iota(jnp.int32, (bn, c), 1)
    class_mask = (col == t).astype(jnp.float32)            # one-hot of targets

    # log-sum-exp formulation: log_p = x[target] - lse(x)
    m = jnp.max(x, axis=1, keepdims=True)                  # (bn, 1)
    lse = m + jnp.log(jnp.sum(jnp.exp(x - m), axis=1, keepdims=True))
    x_t = jnp.sum(x * class_mask, axis=1, keepdims=True)   # target-class logit
    alpha_sel = jnp.sum(a * class_mask, axis=1, keepdims=True)

    log_p = x_t - lse                                       # log softmax[target]
    probs = jnp.exp(log_p)
    one_minus_p = 1.0 - probs

    g = float(gamma)
    if g == 2.0:                                            # module default
        focal = one_minus_p * one_minus_p
    elif g == 1.0:
        focal = one_minus_p
    elif g == 0.0:
        focal = jnp.ones_like(one_minus_p)
    else:
        # general (possibly fractional) gamma: clamp to avoid NaN if 1-p < 0
        focal = jnp.power(jnp.maximum(one_minus_p, 0.0), g)

    row_loss = -alpha_sel * focal * log_p                   # (bn, 1)

    # Drop rows of the final partial tile beyond the true batch size.  Use a
    # select so unspecified padded data (possibly NaN/inf) cannot leak in.
    pid = pl.program_id(0)
    row_idx = pid * block_n + jax.lax.broadcasted_iota(jnp.int32, (bn, 1), 0)
    row_loss = jnp.where(row_idx < n_total, row_loss, 0.0)

    partial = jnp.sum(row_loss)                              # scalar f32
    o_ref[...] = jnp.broadcast_to(partial, o_ref.shape).astype(o_ref.dtype)


def focal_loss(inputs, targets, alpha, *, gamma=2.0, size_average=True,
               block_n=512):
    """inputs: (N, C) float, targets: (N,) int, alpha: (C,) float -> scalar."""
    n, c = inputs.shape
    targets2d = targets.astype(jnp.int32).reshape(n, 1)
    alpha2d = alpha.astype(jnp.float32).reshape(1, c)

    # Tile the batch so one logits buffer is <= ~4 MiB: comfortably
    # double-buffered in scoped VMEM on v5e/v6e (128 MiB) and v7x (64 MiB).
    itemsize = jnp.dtype(inputs.dtype).itemsize
    rows_cap = max(8, ((4 * 1024 * 1024) // max(1, c * itemsize)) // 8 * 8)
    bn = min(int(block_n), rows_cap, _round_up(n, 8))
    bn = max(8, (bn // 8) * 8)
    grid_n = pl.cdiv(n, bn)

    kernel = functools.partial(
        _focal_loss_kernel, gamma=float(gamma), n_total=n, block_n=bn
    )

    partials = pl.pallas_call(
        kernel,
        out_shape=jax.ShapeDtypeStruct((grid_n, 1, 128), jnp.float32),
        grid_spec=pltpu.PrefetchScalarGridSpec(
            num_scalar_prefetch=0,
            grid=(grid_n,),
            in_specs=[
                pl.BlockSpec((bn, c), lambda i: (i, 0)),     # logits tile
                pl.BlockSpec((bn, 1), lambda i: (i, 0)),     # targets tile
                pl.BlockSpec((1, c), lambda i: (0, 0)),      # alpha (resident)
            ],
            out_specs=pl.BlockSpec((1, 1, 128), lambda i: (i, 0, 0)),
        ),
        compiler_params=pltpu.CompilerParams(
            dimension_semantics=("parallel",),               # megacore-friendly
        ),
    )(inputs, targets2d, alpha2d)

    # Two-stage reduction: tiny final sum (and the single 1/N) in plain JAX.
    total = jnp.sum(partials[:, 0, 0])
    if size_average:
        total = total / jnp.float32(n)
    return total


if __name__ == "__main__":
    key = jax.random.PRNGKey(0)
    k1, k2, k3, k4 = jax.random.split(key, 4)

    def ref_focal(inputs, targets, alpha, gamma, size_average):
        p = jax.nn.softmax(inputs.astype(jnp.float32), axis=1)
        nn = inputs.shape[0]
        probs = p[jnp.arange(nn), targets]
        per = -alpha[targets] * (1.0 - probs) ** gamma * jnp.log(probs)
        return jnp.mean(per) if size_average else jnp.sum(per)

    # Case 1: module defaults (alpha = ones, gamma = 2, size_average = True).
    N, C = 8, 16
    inputs = jax.random.normal(k1, (N, C), dtype=jnp.float32)
    targets = jax.random.randint(k2, (N,), 0, C, dtype=jnp.int32)
    alpha = jnp.ones((C,), dtype=jnp.float32)

    loss = focal_loss(inputs, targets, alpha, gamma=2.0, size_average=True)
    jax.block_until_ready(loss)
    ref = ref_focal(inputs, targets, alpha, 2.0, True)
    assert jnp.allclose(loss, ref, rtol=1e-5, atol=1e-6), (loss, ref)

    # Case 2: multi-tile grid with a partial last tile + sum reduction.
    N2, C2 = 20, 16
    inputs2 = jax.random.normal(k3, (N2, C2), dtype=jnp.float32)
    targets2 = jax.random.randint(k4, (N2,), 0, C2, dtype=jnp.int32)
    alpha2 = jnp.ones((C2,), dtype=jnp.float32)

    loss2 = focal_loss(inputs2, targets2, alpha2, gamma=2.0,
                       size_average=False, block_n=8)
    jax.block_until_ready(loss2)
    ref2 = ref_focal(inputs2, targets2, alpha2, 2.0, False)
    assert jnp.allclose(loss2, ref2, rtol=1e-5, atol=1e-5), (loss2, ref2)

    # Case 3: bf16 logits stay bf16 through the DMA (cast inside the kernel).
    inputs3 = inputs.astype(jnp.bfloat16)
    loss3 = focal_loss(inputs3, targets, alpha, gamma=2.0, size_average=True)
    jax.block_until_ready(loss3)
    ref3 = ref_focal(inputs3, targets, alpha, 2.0, True)
    assert jnp.allclose(loss3, ref3, rtol=1e-4, atol=1e-5), (loss3, ref3)

    print("KERNEL_OK")
</pallas_src>

<mosaic_0001>
module attributes {stable_mosaic.version = 11 : i64} {
  func.func @_focal_loss_kernel(%arg0: i32, %arg1: memref<8x16xf32, #tpu.memory_space<vmem>>, %arg2: memref<8x1xi32, #tpu.memory_space<vmem>>, %arg3: memref<1x16xf32, #tpu.memory_space<vmem>>, %arg4: memref<1x1x128xf32, #tpu.memory_space<vmem>>) attributes {dimension_semantics = [#tpu.dimension_semantics<parallel>], iteration_bounds = array<i64: 1>, scalar_prefetch = 0 : i64, scratch_operands = 0 : i64, tpu.core_type = #tpu.core_type<tc>, window_params = [{transform_indices = @transform_0, window_bounds = array<i64: 8, 16>}, {transform_indices = @transform_1, window_bounds = array<i64: 8, 1>}, {pipeline_mode = #tpu.pipeline_mode<synchronous>, transform_indices = @transform_2, window_bounds = array<i64: 1, 16>}, {transform_indices = @transform_3, window_bounds = array<i64: 1, 1, 128>}]} {
    %c0 = arith.constant 0 : index
    %c0_0 = arith.constant 0 : index
    %0 = vector.load %arg1[%c0, %c0_0] : memref<8x16xf32, #tpu.memory_space<vmem>>, vector<8x16xf32>
    %c0_1 = arith.constant 0 : index
    %c0_2 = arith.constant 0 : index
    %1 = vector.load %arg2[%c0_1, %c0_2] : memref<8x1xi32, #tpu.memory_space<vmem>>, vector<8x1xi32>
    %c0_3 = arith.constant 0 : index
    %c0_4 = arith.constant 0 : index
    %2 = vector.load %arg3[%c0_3, %c0_4] : memref<1x16xf32, #tpu.memory_space<vmem>>, vector<1x16xf32>
    %3 = tpu.iota {dimensions = array<i32: 1>} : vector<8x16xi32>
    %4 = vector.broadcast %1 : vector<8x1xi32> to vector<8x16xi32>
    %5 = arith.cmpi eq, %3, %4 : vector<8x16xi32>
    %6 = arith.extui %5 : vector<8x16xi1> to vector<8x16xi32>
    %7 = arith.sitofp %6 : vector<8x16xi32> to vector<8x16xf32>
    %cst = arith.constant dense<0xFF800000> : vector<8xf32>
    %8 = vector.multi_reduction <maximumf>, %0, %cst [1] : vector<8x16xf32> to vector<8xf32>
    %9 = vector.shape_cast %8 : vector<8xf32> to vector<8x1xf32>
    %10 = vector.broadcast %9 : vector<8x1xf32> to vector<8x16xf32>
    %11 = arith.subf %0, %10 : vector<8x16xf32>
    %12 = math.exp %11 : vector<8x16xf32>
    %cst_5 = arith.constant dense<0.000000e+00> : vector<8xf32>
    %13 = vector.multi_reduction <add>, %12, %cst_5 [1] : vector<8x16xf32> to vector<8xf32>
    %14 = vector.shape_cast %13 : vector<8xf32> to vector<8x1xf32>
    %15 = math.log %14 : vector<8x1xf32>
    %16 = arith.addf %9, %15 : vector<8x1xf32>
    %17 = arith.mulf %0, %7 : vector<8x16xf32>
    %cst_6 = arith.constant dense<0.000000e+00> : vector<8xf32>
    %18 = vector.multi_reduction <add>, %17, %cst_6 [1] : vector<8x16xf32> to vector<8xf32>
    %19 = vector.shape_cast %18 : vector<8xf32> to vector<8x1xf32>
    %20 = vector.broadcast %2 : vector<1x16xf32> to vector<8x16xf32>
    %21 = arith.mulf %20, %7 : vector<8x16xf32>
    %cst_7 = arith.constant dense<0.000000e+00> : vector<8xf32>
    %22 = vector.multi_reduction <add>, %21, %cst_7 [1] : vector<8x16xf32> to vector<8xf32>
    %23 = vector.shape_cast %22 : vector<8xf32> to vector<8x1xf32>
    %24 = arith.subf %19, %16 : vector<8x1xf32>
    %25 = math.exp %24 : vector<8x1xf32>
    %cst_8 = arith.constant 1.000000e+00 : f32
    %26 = vector.broadcast %cst_8 : f32 to vector<8x1xf32>
    %27 = arith.subf %26, %25 : vector<8x1xf32>
    %28 = arith.mulf %27, %27 : vector<8x1xf32>
    %cst_9 = arith.constant 0.000000e+00 : f32
    %29 = vector.broadcast %cst_9 : f32 to vector<8x1xf32>
    %30 = arith.subf %29, %23 : vector<8x1xf32>
    %31 = arith.mulf %30, %28 : vector<8x1xf32>
    %32 = arith.mulf %31, %24 : vector<8x1xf32>
    %c8_i32 = arith.constant 8 : i32
    %33 = arith.muli %arg0, %c8_i32 : i32
    %34 = tpu.iota {dimensions = array<i32: 0>} : vector<8x1xi32>
    %35 = vector.broadcast %33 : i32 to vector<8x1xi32>
    %36 = arith.addi %35, %34 : vector<8x1xi32>
    %c8_i32_10 = arith.constant 8 : i32
    %37 = vector.broadcast %c8_i32_10 : i32 to vector<8x1xi32>
    %38 = arith.cmpi slt, %36, %37 : vector<8x1xi32>
    %cst_11 = arith.constant 0.000000e+00 : f32
    %39 = vector.broadcast %cst_11 : f32 to vector<8x1xf32>
    %40 = arith.select %38, %32, %39 : vector<8x1xi1>, vector<8x1xf32>
    %41 = vector.shape_cast %40 : vector<8x1xf32> to vector<1x8x1xf32>
    %cst_12 = arith.constant dense<0.000000e+00> : vector<1xf32>
    %42 = vector.multi_reduction <add>, %41, %cst_12 [1, 2] : vector<1x8x1xf32> to vector<1xf32>
    %43 = vector.shape_cast %42 : vector<1xf32> to vector<1x1x1xf32>
    %44 = vector.extract %43[0, 0, 0] : f32 from vector<1x1x1xf32>
    %45 = vector.broadcast %44 : f32 to vector<1x1x128xf32>
    %c0_13 = arith.constant 0 : index
    %c0_14 = arith.constant 0 : index
    %c0_15 = arith.constant 0 : index
    %46 = vector.load %arg4[%c0_13, %c0_14, %c0_15] : memref<1x1x128xf32, #tpu.memory_space<vmem>>, vector<1x1x128xf32>
    tpu.vector_store %arg4[%c0_13, %c0_14, %c0_15], %45 {strides = array<i32>} : memref<1x1x128xf32, #tpu.memory_space<vmem>>, vector<1x1x128xf32>,
    return
  }
  func.func @transform_0(%arg0: i32) -> (i32, i32) {
    %c0_i32 = arith.constant 0 : i32
    %c0_i32_0 = arith.constant 0 : i32
    return %arg0, %c0_i32 : i32, i32
  }
  func.func @transform_1(%arg0: i32) -> (i32, i32) {
    %c0_i32 = arith.constant 0 : i32
    %c0_i32_0 = arith.constant 0 : i32
    return %arg0, %c0_i32 : i32, i32
  }
  func.func @transform_2(%arg0: i32) -> (i32, i32) {
    %c0_i32 = arith.constant 0 : i32
    %c0_i32_0 = arith.constant 0 : i32
    %c0_i32_1 = arith.constant 0 : i32
    return %c0_i32, %c0_i32_0 : i32, i32
  }
  func.func @transform_3(%arg0: i32) -> (i32, i32, i32) {
    %c0_i32 = arith.constant 0 : i32
    %c0_i32_0 = arith.constant 0 : i32
    %c0_i32_1 = arith.constant 0 : i32
    return %arg0, %c0_i32, %c0_i32_0 : i32, i32, i32
  }
}

</mosaic_0001>

<bundles_post_ra>
// kernel: tpu_custom_call.1
= control target key start
LH: loop header
LB: loop body
LE: loop exit
PB: predicated region body
PF: predicated region fallthrough
CT: control target
= control target key end

     0   :  { %vm26_vm0 = vcmask 130048   ;;  %s170_s0 = inlined_call_operand.vmem [shape: f32[8,16], index: 0, kind: input, shape index: {}]   ;;  %s171_s1 = inlined_call_operand.vmem [shape: s32[8,1], index: 1, kind: input, shape index: {}]   ;;  %s172_s2 = inlined_call_operand.vmem [shape: f32[1,16], index: 2, kind: input, shape index: {}]   ;;  %s173_s3 = inlined_call_operand.hbm [shape: f32[1,1,128], index: 3, kind: output, shape index: {}]  }
   0x1   :  { %v15_v0 = vld [vmem:[%s170_s0] sm:$0xff] }
   0x2   :  { %8 = vsyncpa [#allocation3], 0  ;;  %v27_v1 = vsel %vm26_vm0, %v15_v0, -inf  ;;  %v131_v2 = vmov 0   ;;  %v16_v3 = vld [vmem:[%s171_s1] sm:$0xff]  ;;  %v18_v7 = vlaneseq  ;;  %v132_v10 = vmov 0.0  }
   0x3   :  { %102 = vset.pattern.permute.xlu0 %v131_v2  ;;  %v96_v14 = vld [vmem:[%s172_s2] ss:$0 sm:$0xff]  ;;  %vm68_vm2 = vcmask 7168   ;;  %s133_s1 = smov [#allocation2]  }
   0x4   :  { %28 = vmax.xlane.f32.xlu0 %v27_v1  ;;  %v19_v8 = vand.u32 127, %v18_v7  ;;  %s87_s2 = sshll.u32 %s133_s1, 4  ;;  %s88_s2 = int_to_ptr.vmem [resolvable:$true] %s87_s2 }
   0x5   :  { %s109_s18 = scalar_lea.vmem %s88_s2, 16  ;;  %s113_s19 = scalar_lea.vmem %s88_s2, 32 }
   0x6   :  { %p110_p0 = scmp.ne.s32.totalorder %s88_s2, %s109_s18  ;;  %p114_p1 = scmp.lt.s32.totalorder %s88_s2, %s88_s2 }
   0x7   :  { %p115_p2 = scmp.lt.s32.totalorder %s113_s19, %s109_s18 }
   0x9   :  { %p116_p3 = por %p115_p2, %p114_p1 }
   0xb   :  { %p117_p4 = pnand %p116_p3, %p110_p0 }
  0x1a   :  { %21 = vperm.xlu0 %102, %v16_v3  }
  0x8d   :  { %v29_v4 = vpop.xlane.xlu0 %28 }
  0x8e   :  { %v30_v5 = vsub.f32 %v15_v0, %v29_v4 }
  0x90   :  { %v31_v6 = vmul.f32 1.442695, %v30_v5 }
  0x92   :  { %103 = vpow2.f32 %v31_v6 }
  0x95   :  { %v22_v9 = vpop.permute.xlu0 %21 }
  0x96   :  { %vm23_vm1 = vcmp.eq.s32.totalorder %v19_v8, %v22_v9 }
  0x97   :  { %v95_v11 = vsel %vm23_vm1, 1.0, %v132_v10 }
  0x98   :  { %v39_v12 = vmul.f32 %v95_v11, %v15_v0  ;;  %v49_v17 = vmul.f32 %v96_v14, %v95_v11 }
  0x9a   :  { %v40_v16 = vsel %vm26_vm0, %v39_v12, 0.0  ;;  %v50_v18 = vsel %vm26_vm0, %v49_v17, 0.0 }
  0x9f   :  { %v104_v13 = vpop.eup %103 }
  0xa0   :  { %v33_v15 = vsel %vm26_vm0, %v104_v13, 0.0 }
  0xa1   :  { %34 = vadd.xlane.f32.xlu1 %v33_v15 }
  0xa5   :  { %41 = vadd.xlane.f32.xlu1 %v40_v16 }
  0xa9   :  { %51 = vadd.xlane.f32.xlu1 %v50_v18 }
 0x12a   :  { %v35_v19 = vpop.xlane.xlu1 %34 }
 0x12b   :  { %105 = vlog2.f32 %v35_v19 }
 0x12e   :  { %v42_v23 = vpop.xlane.xlu1 %41 }
 0x132   :  { %v52_v27 = vpop.xlane.xlu1 %51 }
 0x133   :  { %v58_v30 = vsub.f32 0.0, %v52_v27 }
 0x138   :  { %v106_v20 = vpop.eup %105 }
 0x139   :  { %v37_v21 = vmul.f32 0.6931472, %v106_v20 }
 0x13b   :  { %v38_v22 = vadd.f32 %v37_v21, %v29_v4 }
 0x13d   :  { %v53_v24 = vsub.f32 %v42_v23, %v38_v22 }
 0x13f   :  { %v54_v25 = vmul.f32 1.442695, %v53_v24 }
 0x141   :  { %107 = vpow2.f32 %v54_v25 }
 0x14e   :  { %v108_v26 = vpop.eup %107 }
 0x14f   :  { %v56_v28 = vsub.f32 1.0, %v108_v26 }
 0x151   :  { %v57_v29 = vmul.f32 %v56_v28, %v56_v28 }
 0x153   :  { %v59_v31 = vmul.f32 %v58_v30, %v57_v29 }
 0x155   :  { %v60_v32 = vmul.f32 %v59_v31, %v53_v24 }
 0x157   :  { %v69_v33 = vsel %vm68_vm2, %v60_v32, 0.0 }
 0x158   :  { %70 = vadd.xlane.f32.xlu1 %v69_v33 }
 0x1e1   :  { %v71_v34 = vpop.xlane.xlu1 %70 }
 0x1e2   :  { %v72_v35 = vrot.slane %v71_v34, 4 }
 0x1e4   :  { %v73_v36 = vadd.f32 %v72_v35, %v71_v34 }
 0x1e6   :  { %v74_v37 = vrot.slane %v73_v36, 2 }
 0x1e8   :  { %v75_v38 = vadd.f32 %v74_v37, %v73_v36 }
 0x1ea   :  { %v76_v39 = vrot.slane %v75_v38, 1 }
 0x1ec   :  { %v77_v40 = vadd.f32 %v76_v39, %v75_v38 }
 0x1ee   :  { %97 = vpush %v77_v40 }
 0x21f   :  { %s98_s17 = spop %97 }
 0x220   :  { %v79_v41 = vstv %s98_s17 }
 0x221   :  { %80 = vst [vmem:[#allocation2] sm:$0x1] %v79_v41 }
 0x222   :  { %120 = shalt.err (!%p117_p4)
}
 0x223   :  { %90 = dma.vmem_to_hbm [thread:$0]  %s88_s2, 16, %s173_s3, [#allocation3]  }
 0x224   :  { %129 = dma.done.wait [#allocation3], 16  }
 0x225   :  { %130 = vsyncadd [#allocation3], 4294967280 }
 0x226   :  { %94 = vsyncpa [#allocation3], 1 }

</bundles_post_ra>
